<compile_context>
chip_gen: v7x
topology: tpu7x:2x2x1
jax: 0.10.0
libtpu: 0.0.40
codegen_flags: <defaults>
</compile_context>

<pallas_src>
import jax
import jax.numpy as jnp
from jax.experimental import pallas as pl
from jax.experimental.pallas import tpu as pltpu


def fourier_feature_kernel(t_ref, coeff_ref, out_ref):
    # t_ref:     (1, TN)   current tile of time samples, lane-dense
    # coeff_ref: (2F, 1)   [sine_coeff ; cosine_coeff] stacked along sublanes
    # out_ref:   (2F, TN)  transposed features: rows [0:F) = sin, rows [F:2F) = cos
    F = coeff_ref.shape[0] // 2
    t = t_ref[...]                 # (1, TN)
    sw = coeff_ref[0:F, :]         # (F, 1)
    cw = coeff_ref[F:, :]          # (F, 1)

    # Contraction dim of the torch matmul is 1, so t @ W.T == broadcasted
    # elementwise product.  (F,1)*(1,TN) -> (F,TN), fully lane-dense on the VPU/EUP.
    out_ref[0:F, :] = jnp.sin(sw * t)   # sin features
    out_ref[F:, :] = jnp.cos(cw * t)    # cos features


def fourier_feature_layer(t, sine_coeff, cosine_coeff, *, tile_n=1024):
    """t: (N, 1); sine_coeff, cosine_coeff: (F, 1). Returns (N, 2F)."""
    N = t.shape[0]
    F = sine_coeff.shape[0]
    assert t.shape == (N, 1)
    assert sine_coeff.shape == (F, 1) and cosine_coeff.shape == (F, 1)
    dtype = t.dtype

    # Lane tile must be a multiple of 128; keep it no larger than the (padded) N.
    tile_n = max(128, pl.cdiv(tile_n, 128) * 128)
    eff_tile = min(tile_n, pl.cdiv(N, 128) * 128)
    n_pad = pl.cdiv(N, eff_tile) * eff_tile

    # Present t with samples on the lane axis (free relayout), pad the tail.
    t_row = t.reshape(1, N)
    if n_pad != N:
        t_row = jnp.pad(t_row, ((0, 0), (0, n_pad - N)))

    # Single constant parameter block; its index_map never changes across the grid.
    coeff = jnp.concatenate([sine_coeff, cosine_coeff], axis=0)  # (2F, 1)

    grid = (n_pad // eff_tile,)
    out_t = pl.pallas_call(
        fourier_feature_kernel,
        out_shape=jax.ShapeDtypeStruct((2 * F, n_pad), dtype),
        grid_spec=pl.GridSpec(
            grid=grid,
            in_specs=[
                pl.BlockSpec((1, eff_tile), lambda i: (0, i)),   # t tile (lane-dense)
                pl.BlockSpec((2 * F, 1), lambda i: (0, 0)),      # constant coeffs
            ],
            out_specs=pl.BlockSpec((2 * F, eff_tile), lambda i: (0, i)),
        ),
        compiler_params=pltpu.CompilerParams(
            dimension_semantics=("parallel",),
        ),
    )(t_row, coeff)

    # Back to the PyTorch layout: (N, 2F) with [sin | cos] along dim 1.
    return out_t[:, :N].T


def fourier_feature_ref(t, sine_coeff, cosine_coeff):
    """Pure-JAX reference mirroring the PyTorch forward exactly."""
    sine_feats = jnp.sin(jnp.matmul(t, sine_coeff.T))
    cosine_feats = jnp.cos(jnp.matmul(t, cosine_coeff.T))
    return jnp.concatenate([sine_feats, cosine_feats], axis=1)


if __name__ == "__main__":
    key = jax.random.PRNGKey(0)
    k_t, k_s, k_c = jax.random.split(key, 3)

    N = 16              # number of time samples (batch of t values)
    num_features = 8    # module's num_features

    # Deterministic "torch.normal(0, 1, size=(num_features, 1))" equivalents.
    sine_coeff = jax.random.normal(k_s, (num_features, 1), dtype=jnp.float32)
    cosine_coeff = jax.random.normal(k_c, (num_features, 1), dtype=jnp.float32)

    # Input t: (N, 1), as implied by matmul(t, coeff.T).
    t = jax.random.normal(k_t, (N, 1), dtype=jnp.float32)

    out = fourier_feature_layer(t, sine_coeff, cosine_coeff)
    out = jax.block_until_ready(out)

    ref = fourier_feature_ref(t, sine_coeff, cosine_coeff)
    assert out.shape == (N, 2 * num_features), out.shape
    assert jnp.allclose(out, ref, atol=1e-5, rtol=1e-5), "mismatch vs reference"

    print("KERNEL_OK")
</pallas_src>

<mosaic_0001>
module attributes {stable_mosaic.version = 11 : i64} {
  func.func @fourier_feature_kernel(%arg0: i32, %arg1: memref<1x128xf32, #tpu.memory_space<vmem>>, %arg2: memref<16x1xf32, #tpu.memory_space<vmem>>, %arg3: memref<16x128xf32, #tpu.memory_space<vmem>>) attributes {dimension_semantics = [#tpu.dimension_semantics<parallel>], iteration_bounds = array<i64: 1>, scalar_prefetch = 0 : i64, scratch_operands = 0 : i64, tpu.core_type = #tpu.core_type<tc>, window_params = [{transform_indices = @transform_0, window_bounds = array<i64: 1, 128>}, {pipeline_mode = #tpu.pipeline_mode<synchronous>, transform_indices = @transform_1, window_bounds = array<i64: 16, 1>}, {transform_indices = @transform_2, window_bounds = array<i64: 16, 128>}]} {
    %c0 = arith.constant 0 : index
    %c0_0 = arith.constant 0 : index
    %0 = vector.load %arg1[%c0, %c0_0] : memref<1x128xf32, #tpu.memory_space<vmem>>, vector<1x128xf32>
    %c0_1 = arith.constant 0 : index
    %c0_2 = arith.constant 0 : index
    %1 = vector.load %arg2[%c0_1, %c0_2] : memref<16x1xf32, #tpu.memory_space<vmem>>, vector<8x1xf32>
    %c8 = arith.constant 8 : index
    %c0_3 = arith.constant 0 : index
    %2 = vector.load %arg2[%c8, %c0_3] : memref<16x1xf32, #tpu.memory_space<vmem>>, vector<8x1xf32>
    %3 = vector.broadcast %1 : vector<8x1xf32> to vector<8x128xf32>
    %4 = vector.broadcast %0 : vector<1x128xf32> to vector<8x128xf32>
    %5 = arith.mulf %3, %4 : vector<8x128xf32>
    %6 = math.sin %5 : vector<8x128xf32>
    %c0_4 = arith.constant 0 : index
    %c0_5 = arith.constant 0 : index
    %7 = vector.load %arg3[%c0_4, %c0_5] : memref<16x128xf32, #tpu.memory_space<vmem>>, vector<8x128xf32>
    tpu.vector_store %arg3[%c0_4, %c0_5], %6 {strides = array<i32>} : memref<16x128xf32, #tpu.memory_space<vmem>>, vector<8x128xf32>,
    %8 = vector.broadcast %2 : vector<8x1xf32> to vector<8x128xf32>
    %9 = vector.broadcast %0 : vector<1x128xf32> to vector<8x128xf32>
    %10 = arith.mulf %8, %9 : vector<8x128xf32>
    %11 = math.cos %10 : vector<8x128xf32>
    %c8_6 = arith.constant 8 : index
    %c0_7 = arith.constant 0 : index
    %12 = vector.load %arg3[%c8_6, %c0_7] : memref<16x128xf32, #tpu.memory_space<vmem>>, vector<8x128xf32>
    tpu.vector_store %arg3[%c8_6, %c0_7], %11 {strides = array<i32>} : memref<16x128xf32, #tpu.memory_space<vmem>>, vector<8x128xf32>,
    return
  }
  func.func @transform_0(%arg0: i32) -> (i32, i32) {
    %c0_i32 = arith.constant 0 : i32
    %c0_i32_0 = arith.constant 0 : i32
    return %c0_i32, %arg0 : i32, i32
  }
  func.func @transform_1(%arg0: i32) -> (i32, i32) {
    %c0_i32 = arith.constant 0 : i32
    %c0_i32_0 = arith.constant 0 : i32
    %c0_i32_1 = arith.constant 0 : i32
    return %c0_i32, %c0_i32_0 : i32, i32
  }
  func.func @transform_2(%arg0: i32) -> (i32, i32) {
    %c0_i32 = arith.constant 0 : i32
    %c0_i32_0 = arith.constant 0 : i32
    return %c0_i32, %arg0 : i32, i32
  }
}

</mosaic_0001>

<bundles_post_ra>
// kernel: tpu_custom_call.1
= control target key start
LH: loop header
LB: loop body
LE: loop exit
PB: predicated region body
PF: predicated region fallthrough
CT: control target
= control target key end

     0   :  { %v318_v1 = vmov 0   ;;  %s432_s0 = inlined_call_operand.vmem [shape: f32[1,128], index: 0, kind: input, shape index: {}]   ;;  %s433_s1 = inlined_call_operand.vmem [shape: f32[16,1], index: 1, kind: input, shape index: {}]   ;;  %s434_s2 = inlined_call_operand.hbm [shape: f32[16,128], index: 2, kind: output, shape index: {}]  }
   0x1   :  { %v13_v0 = vld [vmem:[%s433_s1] sm:$0xff]  ;;  %285 = vset.pattern.permute.xlu0 %v318_v1  ;;  %v14_v2 = vld [vmem:[%s433_s1 + $0x8] sm:$0xff] }
   0x2   :  { %17 = vperm.xlu0 %285, %v13_v0  }
   0x3   :  { %7 = vsyncpa [#allocation3], 0  ;;  %v258_v3 = vld [vmem:[%s432_s0] ss:$0 sm:$0xff]  ;;  %v319_v24 = vmov 683565275  }
   0x4   :  { %v320_v28 = vmov 2475754826   ;;  %v321_v30 = vmov 2131351028   ;;  %v322_v32 = vmov 2102212464  }
   0x5   :  { %v323_v34 = vmov 920167782   ;;  %v324_v41 = vmov 1326507024   ;;  %s325_s0 = smov [#allocation2]  }
   0x6   :  { %134 = vperm.xlu0 %285, %v14_v2   ;;  %s247_s1 = sshll.u32 %s325_s0, 4  ;;  %s248_s1 = int_to_ptr.vmem [resolvable:$true] %s247_s1 }
   0x7   :  { %s294_s15 = scalar_lea.vmem %s248_s1, 256  ;;  %p299_p1 = scmp.lt.s32.totalorder %s248_s1, %s248_s1 }
   0x8   :  { %p295_p0 = scmp.ne.s32.totalorder %s248_s1, %s294_s15  ;;  %p300_p2 = scmp.lt.s32.totalorder %s294_s15, %s294_s15 }
   0xa   :  { %p301_p3 = por %p300_p2, %p299_p1 }
   0xc   :  { %p302_p4 = pnand %p301_p3, %p295_p0 }
  0x81   :  { %v18_v4 = vpop.permute.xlu0 %17 }
  0x82   :  { %v352_v5 = vmul.f32 %v258_v3, %v18_v4 }
  0x84   :  { %v27_v6 = vand.u32 2147483647, %v352_v5  ;;  %v30_v7 = vand.u32 2139095040, %v352_v5  ;;  %vm29_vm14 = vcmp.lt.s32.totalorder %v352_v5, 0 }
  0x85   :  { %v135_v8 = vpop.permute.xlu0 %134 }
  0x86   :  { %v31_v9 = vshrl.u32 %v30_v7, 23  ;;  %v356_v10 = vmul.f32 %v258_v3, %v135_v8  ;;  %v34_v11 = vand.u32 8388607, %v27_v6  ;;  %vm28_vm15 = vcmp.le.f32.partialorder %v27_v6, 0.7853982 }
  0x88   :  { %v259_v12 = vadd.s32 4294967169, %v31_v9  ;;  %v141_v13 = vand.u32 2139095040, %v356_v10  ;;  %v35_v15 = vor.u32 8388608, %v34_v11  ;;  %v138_v17 = vand.u32 2147483647, %v356_v10 }
  0x8a   :  { %v37_v14 = vadd.s32 1, %v259_v12  ;;  %v142_v16 = vshrl.u32 %v141_v13, 23  ;;  %v362_v22 = vshll.u32 %v35_v15, 8  ;;  %v145_v26 = vand.u32 8388607, %v138_v17 }
  0x8c   :  { %vm38_vm0 = vcmp.gt.s32.totalorder %v37_v14, 0  ;;  %v263_v19 = vadd.s32 4294967169, %v142_v16  ;;  %v146_v56 = vor.u32 8388608, %v145_v26 }
  0x8d   :  { %v39_v18 = vsel %vm38_vm0, %v37_v14, 0  ;;  %vm140_vm0 = vcmp.lt.s32.totalorder %v356_v10, 0 }
  0x8e   :  { %v40_v20 = vshrl.u32 %v39_v18, 5  ;;  %v41_v21 = vand.u32 31, %v39_v18  ;;  %v148_v27 = vadd.s32 1, %v263_v19  ;;  %v186_v7 = vshll.u32 %v146_v56, 8 }
  0x90   :  { %v42_v23 = vsub.s32 32, %v41_v21  ;;  %v44_v25 = vshll.u32 %v319_v24, %v41_v21  ;;  %v47_v29 = vshll.u32 %v320_v28, %v41_v21  ;;  %v50_v31 = vshll.u32 %v321_v30, %v41_v21 }
  0x91   :  { %v53_v33 = vshll.u32 %v322_v32, %v41_v21  ;;  %v56_v35 = vshll.u32 %v323_v34, %v41_v21  ;;  %vm59_vm1 = vcmp.lt.s32.totalorder %v40_v20, 1  ;;  %vm61_vm2 = vcmp.lt.s32.totalorder %v40_v20, 3 }
  0x92   :  { %v45_v36 = vshrl.u32 %v320_v28, %v42_v23  ;;  %v48_v37 = vshrl.u32 %v321_v30, %v42_v23  ;;  %v51_v38 = vshrl.u32 %v322_v32, %v42_v23  ;;  %v43_v39 = vshrl.u32 %v319_v24, %v42_v23 }
  0x93   :  { %v54_v40 = vshrl.u32 %v323_v34, %v42_v23  ;;  %v57_v42 = vshrl.u32 %v324_v41, %v42_v23  ;;  %vm149_vm3 = vcmp.gt.s32.totalorder %v148_v27, 0  ;;  %vm62_vm4 = vcmp.lt.s32.totalorder %v40_v20, 4 }
  0x94   :  { %v46_v43 = vor.u32 %v45_v36, %v44_v25  ;;  %v49_v44 = vor.u32 %v48_v37, %v47_v29  ;;  %v52_v45 = vor.u32 %v51_v38, %v50_v31  ;;  %v150_v48 = vsel %vm149_vm3, %v148_v27, 0 }
  0x95   :  { %v55_v46 = vor.u32 %v54_v40, %v53_v33  ;;  %v58_v47 = vor.u32 %v57_v42, %v56_v35  ;;  %vm60_vm5 = vcmp.lt.s32.totalorder %v40_v20, 2  ;;  %v152_v59 = vand.u32 31, %v150_v48 }
  0x96   :  { %v63_v49 = vsel %vm59_vm1, %v43_v39, %v46_v43  ;;  %v64_v50 = vsel %vm62_vm4, %v52_v45, 2102212464  ;;  %v67_v51 = vsel %vm59_vm1, %v46_v43, %v49_v44  ;;  %v71_v52 = vsel %vm59_vm1, %v49_v44, %v52_v45 }
  0x97   :  { %v65_v53 = vsel %vm61_vm2, %v49_v44, %v64_v50  ;;  %v68_v54 = vsel %vm62_vm4, %v55_v46, 920167782  ;;  %v72_v55 = vsel %vm62_vm4, %v58_v47, 1326507024  ;;  %v151_v3 = vshrl.u32 %v150_v48, 5 }
  0x98   :  { %v69_v57 = vsel %vm61_vm2, %v52_v45, %v68_v54  ;;  %v73_v58 = vsel %vm61_vm2, %v55_v46, %v72_v55  ;;  %v66_v60 = vsel %vm60_vm5, %v63_v49, %v65_v53  ;;  %v153_v4 = vsub.s32 32, %v152_v59 }
  0x99   :  { %v70_v61 = vsel %vm60_vm5, %v67_v51, %v69_v57  ;;  %v74_v62 = vsel %vm60_vm5, %v71_v52, %v73_v58  ;;  %v82_v8 = vmul.u32 %v362_v22, %v66_v60  ;;  %v155_v9 = vshll.u32 %v319_v24, %v152_v59 }
  0x9a   :  { %v375_v63 = vmul.u32.u64.low %v362_v22, %v74_v62  ;;  %v376_v0 = vmul.u32.u64.high %v362_v22, %v74_v62, %v375_v63  ;;  %v379_v1 = vmul.u32.u64.low %v362_v22, %v70_v61  ;;  %v380_v2 = vmul.u32.u64.high %v362_v22, %v70_v61, %v379_v1 }
  0x9b   :  { %v158_v11 = vshll.u32 %v320_v28, %v152_v59  ;;  %v161_v12 = vshll.u32 %v321_v30, %v152_v59  ;;  %v156_v13 = vshrl.u32 %v320_v28, %v153_v4  ;;  %v159_v14 = vshrl.u32 %v321_v30, %v153_v4 }
  0x9c   :  { %v162_v15 = vshrl.u32 %v322_v32, %v153_v4  ;;  %v164_v16 = vshll.u32 %v322_v32, %v152_v59  ;;  %vm84_vm6 = vc.u32 %v376_v0, %v379_v1  ;;  %v85_v18 = vadd.s32 1, %v380_v2 }
  0x9d   :  { %v165_v19 = vshrl.u32 %v323_v34, %v153_v4  ;;  %v167_v20 = vshll.u32 %v323_v34, %v152_v59  ;;  %v157_v21 = vor.u32 %v156_v13, %v155_v9  ;;  %v160_v23 = vor.u32 %v159_v14, %v158_v11 }
  0x9e   :  { %v163_v25 = vor.u32 %v162_v15, %v161_v12  ;;  %v168_v26 = vshrl.u32 %v324_v41, %v153_v4  ;;  %v86_v22 = vsel %vm84_vm6, %v85_v18, %v380_v2  ;;  %vm170_vm7 = vcmp.lt.s32.totalorder %v151_v3, 1 }
  0x9f   :  { %v166_v27 = vor.u32 %v165_v19, %v164_v16  ;;  %vm173_vm8 = vcmp.lt.s32.totalorder %v151_v3, 4  ;;  %v87_v28 = vadd.s32 %v86_v22, %v82_v8  ;;  %vm172_vm9 = vcmp.lt.s32.totalorder %v151_v3, 3 }
  0xa0   :  { %v169_v29 = vor.u32 %v168_v26, %v167_v20  ;;  %v175_v30 = vsel %vm173_vm8, %v163_v25, 2102212464  ;;  %v154_v31 = vshrl.u32 %v319_v24, %v153_v4  ;;  %v178_v32 = vsel %vm170_vm7, %v157_v21, %v160_v23 }
  0xa1   :  { %v179_v33 = vsel %vm173_vm8, %v166_v27, 920167782  ;;  %v182_v35 = vsel %vm170_vm7, %v160_v23, %v163_v25  ;;  %v88_v36 = vadd.s32 536870912, %v87_v28  ;;  %vm171_vm10 = vcmp.lt.s32.totalorder %v151_v3, 2 }
  0xa2   :  { %v180_v34 = vsel %vm172_vm9, %v163_v25, %v179_v33  ;;  %v183_v37 = vsel %vm173_vm8, %v169_v29, 1326507024  ;;  %v174_v38 = vsel %vm170_vm7, %v154_v31, %v157_v21  ;;  %v176_v39 = vsel %vm172_vm9, %v160_v23, %v175_v30 }
  0xa3   :  { %v181_v40 = vsel %vm171_vm10, %v178_v32, %v180_v34  ;;  %v184_v41 = vsel %vm172_vm9, %v166_v27, %v183_v37  ;;  %v89_v42 = vshrl.u32 %v88_v36, 30  ;;  %v177_v48 = vsel %vm171_vm10, %v174_v38, %v176_v39 }
  0xa4   :  { %v185_v43 = vsel %vm171_vm10, %v182_v35, %v184_v41  ;;  %v390_v44 = vmul.u32.u64.low %v186_v7, %v181_v40  ;;  %v391_v45 = vmul.u32.u64.high %v186_v7, %v181_v40, %v390_v44  ;;  %v193_v51 = vmul.u32 %v186_v7, %v177_v48 }
  0xa5   :  { %v393_v46 = vmul.u32.u64.low %v186_v7, %v185_v43  ;;  %v394_v47 = vmul.u32.u64.high %v186_v7, %v185_v43, %v393_v46  ;;  %v90_v24 = vshll.u32 %v89_v42, 30  ;;  %v83_v63 = vadd.s32 %v379_v1, %v376_v0 }
  0xa6   :  { %v196_v50 = vadd.s32 1, %v391_v45  ;;  %v113_v21 = vsub.s32 4, %v89_v42  ;;  %vm409_vm1 = vcmp.le.f32.partialorder %v138_v17, 0.7853982  ;;  %vm119_vm5 = vweird.f32 %v352_v5 }
  0xa7   :  { %v91_v49 = vsub.s32 %v87_v28, %v90_v24  ;;  %vm195_vm11 = vc.u32 %v394_v47, %v390_v44  ;;  %v194_v0 = vadd.s32 %v390_v44, %v394_v47  ;;  %vm230_vm9 = vweird.f32 %v356_v10 }
  0xa8   :  { %v197_v53 = vsel %vm195_vm11, %v196_v50, %v391_v45  ;;  %v114_v30 = vsel %vm29_vm14, %v113_v21, %v89_v42 }
  0xa9   :  { %v93_v52 = vsub.s32 0, %v91_v49  ;;  %v198_v54 = vadd.s32 %v197_v53, %v193_v51  ;;  %v116_v35 = vsel %vm28_vm15, 0, %v114_v30 }
  0xaa   :  { %v120_v38 = vadd.s32 3, %v116_v35 }
  0xab   :  { %v260_v55 = vmin.u32 %v93_v52, %v91_v49  ;;  %v199_v56 = vadd.s32 536870912, %v198_v54 }
  0xac   :  { %v121_v41 = vand.u32 3, %v120_v38 }
  0xad   :  { %v95_v57 = vclz %v260_v55  ;;  %v200_v58 = vshrl.u32 %v199_v56, 30 }
  0xae   :  { %vm126_vm2 = vcmp.eq.s32.totalorder %v121_v41, 2  ;;  %vm123_vm3 = vcmp.eq.s32.totalorder %v121_v41, 0  ;;  %vm122_vm4 = vcmp.lt.s32.totalorder %v121_v41, 2 }
  0xaf   :  { %v261_v59 = vadd.s32 4294967294, %v95_v57  ;;  %v201_v60 = vshll.u32 %v200_v58, 30  ;;  %v224_v43 = vsub.s32 4, %v200_v58 }
  0xb1   :  { %vm262_vm12 = vcmp.lt.s32.totalorder %v261_v59, 0  ;;  %v202_v62 = vsub.s32 %v198_v54, %v201_v60  ;;  %v225_v48 = vsel %vm140_vm0, %v224_v43, %v200_v58 }
  0xb2   :  { %v98_v61 = vsel %vm262_vm12, 0, %v261_v59  ;;  %v227_v51 = vsel %vm409_vm1, 0, %v225_v48 }
  0xb3   :  { %v99_v2 = vsub.s32 32, %v98_v61  ;;  %v103_v3 = vsub.s32 4294967266, %v98_v61  ;;  %v204_v4 = vsub.s32 0, %v202_v62  ;;  %v100_v7 = vshll.u32 %v91_v49, %v98_v61 }
  0xb4   :  { %v231_v53 = vand.u32 3, %v227_v51 }
  0xb5   :  { %v101_v8 = vshrl.u32 %v83_v63, %v99_v2  ;;  %v104_v9 = vadd.s32 127, %v103_v3  ;;  %v264_v11 = vmin.u32 %v204_v4, %v202_v62 }
  0xb6   :  { %vm236_vm6 = vcmp.eq.s32.totalorder %v231_v53, 2  ;;  %vm233_vm7 = vcmp.eq.s32.totalorder %v231_v53, 0  ;;  %vm232_vm8 = vcmp.lt.s32.totalorder %v231_v53, 2 }
  0xb7   :  { %v102_v12 = vor.u32 %v101_v8, %v100_v7  ;;  %v105_v13 = vshll.u32 %v104_v9, 23  ;;  %v206_v14 = vclz %v264_v11 }
  0xb9   :  { %v106_v15 = vor.u32 4788187, %v105_v13  ;;  %v265_v16 = vadd.s32 4294967294, %v206_v14  ;;  %v109_v19 = vcvt.s32.f32 %v102_v12 }
  0xbb   :  { %v107_v18 = vand.u32 2147483647, %v106_v15  ;;  %vm266_vm13 = vcmp.lt.s32.totalorder %v265_v16, 0 }
  0xbc   :  { %v209_v23 = vsel %vm266_vm13, 0, %v265_v16 }
  0xbd   :  { %v110_v20 = vmul.f32 %v109_v19, %v107_v18  ;;  %v210_v1 = vsub.s32 32, %v209_v23  ;;  %v214_v25 = vsub.s32 4294967266, %v209_v23  ;;  %v211_v22 = vshll.u32 %v202_v62, %v209_v23 }
  0xbf   :  { %v111_v26 = vxor.u32 2147483648, %v110_v20  ;;  %v212_v27 = vshrl.u32 %v194_v0, %v210_v1  ;;  %v215_v28 = vadd.s32 127, %v214_v25 }
  0xc1   :  { %v112_v29 = vsel %vm29_vm14, %v111_v26, %v110_v20  ;;  %v213_v32 = vor.u32 %v212_v27, %v211_v22  ;;  %v216_v33 = vshll.u32 %v215_v28, 23 }
  0xc2   :  { %v115_v31 = vsel %vm28_vm15, %v352_v5, %v112_v29 }
  0xc3   :  { %286 = vcosq.f32 %v115_v31  ;;  %v217_v36 = vor.u32 4788187, %v216_v33  ;;  %v220_v37 = vcvt.s32.f32 %v213_v32 }
  0xc4   :  { %288 = vsinq.f32 %v115_v31 }
  0xc5   :  { %v218_v34 = vand.u32 2147483647, %v217_v36 }
  0xc7   :  { %v221_v39 = vmul.f32 %v220_v37, %v218_v34 }
  0xc9   :  { %v222_v40 = vxor.u32 2147483648, %v221_v39 }
  0xcb   :  { %v223_v42 = vsel %vm140_vm0, %v222_v40, %v221_v39 }
  0xcc   :  { %v226_v45 = vsel %vm409_vm1, %v356_v10, %v223_v42 }
  0xcd   :  { %v287_v44 = vpop.eup %286  ;;  %290 = vcosq.f32 %v226_v45 }
  0xce   :  { %v289_v46 = vpop.eup %288  ;;  %v127_v47 = vxor.u32 2147483648, %v287_v44  ;;  %292 = vsinq.f32 %v226_v45 }
  0xcf   :  { %v124_v24 = vxor.u32 2147483648, %v289_v46 }
  0xd0   :  { %v128_v49 = vsel %vm126_vm2, %v127_v47, %v289_v46 }
  0xd1   :  { %v125_v17 = vsel %vm123_vm3, %v287_v44, %v124_v24 }
  0xd2   :  { %v129_v50 = vsel %vm122_vm4, %v125_v17, %v128_v49 }
  0xd3   :  { %v130_v52 = vsel %vm119_vm5, nan, %v129_v50 }
  0xd4   :  { %131 = vst [vmem:[#allocation2] sm:$0xff] %v130_v52 }
  0xd7   :  { %v291_v54 = vpop.eup %290 }
  0xd8   :  { %v293_v55 = vpop.eup %292  ;;  %v237_v56 = vxor.u32 2147483648, %v291_v54 }
  0xd9   :  { %v234_v57 = vxor.u32 2147483648, %v293_v55 }
  0xda   :  { %v238_v58 = vsel %vm236_vm6, %v237_v56, %v293_v55 }
  0xdb   :  { %v235_v59 = vsel %vm233_vm7, %v291_v54, %v234_v57 }
  0xdc   :  { %v239_v5 = vsel %vm232_vm8, %v235_v59, %v238_v58 }
  0xdd   :  { %v240_v60 = vsel %vm230_vm9, nan, %v239_v5 }
  0xde   :  { %241 = vst [vmem:[#allocation2 + $0x8] sm:$0xff] %v240_v60 }
  0xdf   :  { %305 = shalt.err (!%p302_p4)
}
  0xe0   :  { %s306_s18 = scalar_lea.hbm %s434_s2, 256 }
  0xe1   :  { %p307_p5 = scmp.ne.s32.totalorder %s434_s2, %s306_s18  ;;  %p310_p6 = scmp.lt.u32.totalorder %s306_s18, %s434_s2 }
  0xe3   :  { %p312_p7 = pnand %p310_p6, %p307_p5 }
  0xe5   :  { %315 = shalt.err (!%p312_p7)
}
  0xe6   :  { %s326_s23 = smov 128   ;;  %s327_s24 = smov 8  }
  0xe7   :  { %253 = dma.vmem_to_hbm [thread:$0]  %s248_s1, 256, %s434_s2, [#allocation3], %s326_s23, %s326_s23, %s327_s24  }
  0xe8   :  { %316 = dma.done.wait [#allocation3], 256  }
  0xe9   :  { %317 = vsyncadd [#allocation3], 4294967040 }
  0xea   :  { %257 = vsyncpa [#allocation3], 1 }

</bundles_post_ra>
